<compile_context>
chip_gen: v7x
topology: tpu7x:2x2x1
jax: 0.10.0
libtpu: 0.0.40
codegen_flags: <defaults>
</compile_context>

<pallas_src>
import functools

import jax
import jax.numpy as jnp
from jax import lax
from jax.experimental import pallas as pl
from jax.experimental.pallas import tpu as pltpu

GAMMA = 1.5
ALPHA = 0.25
LANES = 128
SUBLANES = 8


def _pow_gamma(d, gamma):
    """d ** gamma for d >= 0, specialized at trace time for common gammas."""
    if gamma == 1.5:
        return d * jnp.sqrt(d)          # 1 EUP sqrt + 1 VPU mul (no log/exp)
    if gamma == 2.0:
        return d * d
    if gamma == 1.0:
        return d
    if gamma == 0.5:
        return jnp.sqrt(d)
    # Generic fallback: exp(gamma * log(d)), guarded at d == 0.
    return jnp.where(d > 0.0, jnp.exp(gamma * jnp.log(jnp.maximum(d, 1e-30))), 0.0)


def _qfocal_elementwise(x, t, gamma, alpha):
    """Per-element quality focal loss in f32 (same math as the kernel)."""
    x = x.astype(jnp.float32)
    t = t.astype(jnp.float32)
    # BCEWithLogitsLoss (reduction='none'), numerically stable.
    bce = jnp.maximum(x, 0.0) - x * t + jnp.log1p(jnp.exp(-jnp.abs(x)))
    pred_prob = 0.5 * jnp.tanh(0.5 * x) + 0.5            # == sigmoid(x)
    alpha_factor = (1.0 - alpha) + (2.0 * alpha - 1.0) * t
    return bce * alpha_factor * _pow_gamma(jnp.abs(t - pred_prob), gamma)


def _qfocal_kernel(pred_ref, true_ref, out_ref, acc_ref, *,
                   rows, gamma, alpha, tile_rows, chunk_rows, steps,
                   first_masked_block):
    p = pl.program_id(0)
    j = pl.program_id(1)

    @pl.when(j == 0)
    def _():
        acc_ref[...] = jnp.zeros_like(acc_ref)

    # Logical (unclamped) block index along the row axis.
    logical_block = p * steps + j
    n_chunks = tile_rows // chunk_rows

    def accumulate(masked):
        # Number of in-bounds rows of this logical block (can be <= 0 for
        # duplicate trailing blocks that were clamped onto the last tile).
        rows_in_block = rows - logical_block * tile_rows

        def body(c, carry):
            off = pl.multiple_of(c * chunk_rows, chunk_rows)
            x = pred_ref[pl.ds(off, chunk_rows), :].astype(jnp.float32)
            t = true_ref[pl.ds(off, chunk_rows), :].astype(jnp.float32)

            # Stable BCE-with-logits: max(x,0) - x*t + log1p(exp(-|x|)).
            e = jnp.exp(-jnp.abs(x))
            bce = jnp.maximum(x, 0.0) - x * t + jnp.log1p(e)

            # sigmoid via EUP tanh (no divide / compare+select on the VPU).
            pred_prob = 0.5 * jnp.tanh(0.5 * x) + 0.5

            # alpha_factor folded: t*a + (1-t)*(1-a) == (1-a) + (2a-1)*t.
            alpha_factor = (1.0 - alpha) + (2.0 * alpha - 1.0) * t
            d = jnp.abs(t - pred_prob)
            loss = bce * alpha_factor * _pow_gamma(d, gamma)

            if masked:
                # Zero rows past the end of the real data (ragged last block
                # and clamped duplicate blocks).  jnp.where blocks NaN/Inf
                # from garbage rows from reaching the accumulator.
                rid = lax.broadcasted_iota(jnp.int32, loss.shape, 0) + off
                loss = jnp.where(rid < rows_in_block, loss, 0.0)

            # Fold (chunk_rows,128) -> (8,128) with elementwise vreg adds only.
            acc_ref[...] += loss.reshape(
                chunk_rows // SUBLANES, SUBLANES, LANES).sum(axis=0)
            return carry

        lax.fori_loop(0, n_chunks, body, 0, unroll=True)

    if first_masked_block is None:
        accumulate(False)            # no block can contain padding rows
    else:
        @pl.when(logical_block >= first_masked_block)
        def _():
            accumulate(True)

        @pl.when(logical_block < first_masked_block)
        def _():
            accumulate(False)

    @pl.when(j == pl.num_programs(1) - 1)
    def _():
        out_ref[...] = acc_ref[...]


def qfocal_loss(pred, true, gamma=GAMMA, alpha=ALPHA, *,
                reduction="mean", tile_rows=4096, num_parallel=2):
    """Quality focal loss over BCEWithLogitsLoss (reduction 'mean' or 'sum').

    pred, true: same shape (e.g. NCHW), any float dtype.  bf16 inputs stream
    at bf16 (half the HBM traffic) and are widened to f32 inside the kernel.
    """
    assert pred.shape == true.shape
    total_elems = pred.size
    if total_elems == 0:
        return jnp.float32(0.0)

    flat_pred = pred.reshape(-1)
    flat_true = true.reshape(-1)

    rows = total_elems // LANES
    lane_tail = total_elems - rows * LANES

    # Tiny inputs (< 8 full rows): not worth a kernel launch; pure JAX.
    if rows < SUBLANES:
        total = jnp.sum(_qfocal_elementwise(flat_pred, flat_true, gamma, alpha))
    else:
        # <128-element lane tail handled in plain JAX (rare case); avoids
        # padding / copying the whole array to a multiple of 128.
        if lane_tail:
            tail_sum = jnp.sum(_qfocal_elementwise(
                flat_pred[rows * LANES:], flat_true[rows * LANES:], gamma, alpha))
            main_pred = flat_pred[:rows * LANES]
            main_true = flat_true[:rows * LANES]
        else:
            tail_sum = jnp.float32(0.0)
            main_pred = flat_pred
            main_true = flat_true

        pred2 = main_pred.reshape(rows, LANES)
        true2 = main_true.reshape(rows, LANES)

        # Tile rows: multiple of 8, never larger than the array (so only the
        # pipeline's last block is ragged), capped at the requested size.
        tile_rows = max(SUBLANES,
                        min(int(tile_rows), (rows // SUBLANES) * SUBLANES))
        chunk_rows = 512 if tile_rows % 512 == 0 else tile_rows

        num_tiles = int(pl.cdiv(rows, tile_rows))
        num_parallel = max(1, min(int(num_parallel), num_tiles))
        steps = int(pl.cdiv(num_tiles, num_parallel))
        total_blocks = num_parallel * steps

        # First logical block index that needs the tail-row mask.
        if rows % tile_rows != 0:
            first_masked_block = num_tiles - 1     # ragged last real tile
        else:
            first_masked_block = num_tiles         # only duplicate blocks
        if first_masked_block >= total_blocks:
            first_masked_block = None              # nothing ever needs masking

        if total_blocks == num_tiles:
            in_index_map = lambda p, j: (p * steps + j, 0)
        else:
            # Clamp duplicate trailing blocks onto the last real tile; their
            # contribution is zeroed in-kernel (logical index >= num_tiles).
            last_tile = num_tiles - 1
            in_index_map = lambda p, j: (jnp.minimum(p * steps + j, last_tile), 0)

        kernel = functools.partial(
            _qfocal_kernel,
            rows=rows, gamma=gamma, alpha=alpha,
            tile_rows=tile_rows, chunk_rows=chunk_rows, steps=steps,
            first_masked_block=first_masked_block)

        # Raise the scoped-VMEM limit only if double-buffered inputs get big
        # (e.g. tile_rows=8192 f32 on v6e/v7x); default 4096 fits everywhere.
        in_bytes = tile_rows * LANES * (pred2.dtype.itemsize + true2.dtype.itemsize)
        vmem_limit = None
        if 2 * in_bytes > 12 * 1024 * 1024:
            vmem_limit = min(2 * in_bytes + (8 << 20), 60 << 20)

        partials = pl.pallas_call(
            kernel,
            out_shape=jax.ShapeDtypeStruct((num_parallel * SUBLANES, LANES),
                                           jnp.float32),
            grid_spec=pltpu.PrefetchScalarGridSpec(
                num_scalar_prefetch=0,
                grid=(num_parallel, steps),
                in_specs=[
                    pl.BlockSpec((tile_rows, LANES), in_index_map),
                    pl.BlockSpec((tile_rows, LANES), in_index_map),
                ],
                out_specs=pl.BlockSpec((SUBLANES, LANES), lambda p, j: (p, 0)),
                scratch_shapes=[pltpu.VMEM((SUBLANES, LANES), jnp.float32)],
            ),
            compiler_params=pltpu.CompilerParams(
                dimension_semantics=("parallel", "arbitrary"),
                vmem_limit_bytes=vmem_limit,
            ),
        )(pred2, true2)

        total = jnp.sum(partials) + tail_sum

    if reduction == "sum":
        return total
    if reduction == "mean":
        return total / jnp.float32(total_elems)
    # TODO(synk): reduction='none' needs an elementwise-output kernel variant.
    raise NotImplementedError("reduction='none' is not implemented")


def qfocal_loss_ref(pred, true, gamma=GAMMA, alpha=ALPHA):
    """Independent pure-JAX reference (matches the PyTorch module, mean)."""
    x = pred.astype(jnp.float32)
    t = true.astype(jnp.float32)
    bce = jnp.maximum(x, 0.0) - x * t + jnp.log1p(jnp.exp(-jnp.abs(x)))
    p = jax.nn.sigmoid(x)
    alpha_factor = t * alpha + (1.0 - t) * (1.0 - alpha)
    mod = jnp.abs(t - p) ** gamma
    return jnp.mean(bce * alpha_factor * mod)


if __name__ == "__main__":
    key = jax.random.PRNGKey(0)
    keys = jax.random.split(key, 8)

    # 1) NCHW, small shape consistent with the module: batch=2, channels=4, 16x16.
    pred = jax.random.normal(keys[0], (2, 4, 16, 16), dtype=jnp.float32)
    true = jax.random.uniform(keys[1], (2, 4, 16, 16), dtype=jnp.float32)
    out = jax.block_until_ready(qfocal_loss(pred, true))
    ref = qfocal_loss_ref(pred, true)
    assert jnp.allclose(out, ref, rtol=1e-4, atol=1e-6), (out, ref)

    # 2) Ragged tiny shape (210 elements): exercises the pure-JAX small path.
    pred2 = jax.random.normal(keys[2], (2, 3, 7, 5), dtype=jnp.float32)
    true2 = jax.random.uniform(keys[3], (2, 3, 7, 5), dtype=jnp.float32)
    out2 = jax.block_until_ready(qfocal_loss(pred2, true2))
    ref2 = qfocal_loss_ref(pred2, true2)
    assert jnp.allclose(out2, ref2, rtol=1e-4, atol=1e-6), (out2, ref2)

    # 3) Multi-tile, two parallel streams, ragged masked last block and
    #    clamped duplicate block (small forced tile keeps the test cheap).
    pred3 = jax.random.normal(keys[4], (2, 4, 100, 128), dtype=jnp.float32)
    true3 = jax.random.uniform(keys[5], (2, 4, 100, 128), dtype=jnp.float32)
    out3 = jax.block_until_ready(qfocal_loss(pred3, true3, tile_rows=64))
    ref3 = qfocal_loss_ref(pred3, true3)
    assert jnp.allclose(out3, ref3, rtol=1e-4, atol=1e-6), (out3, ref3)

    # 4) bf16 inputs, 128-lane-aligned: default 4096-row tiles, no padding,
    #    sub-chunked accumulation loop, no masking.
    pred4 = jax.random.normal(keys[6], (8, 16, 64, 128), dtype=jnp.bfloat16)
    true4 = jax.random.uniform(keys[7], (8, 16, 64, 128), dtype=jnp.bfloat16)
    out4 = jax.block_until_ready(qfocal_loss(pred4, true4))
    ref4 = qfocal_loss_ref(pred4, true4)
    assert jnp.allclose(out4, ref4, rtol=1e-4, atol=1e-6), (out4, ref4)

    print("KERNEL_OK")
</pallas_src>

<mosaic_0001>
module attributes {stable_mosaic.version = 11 : i64} {
  func.func @_qfocal_kernel(%arg0: i32, %arg1: i32, %arg2: memref<16x128xf32, #tpu.memory_space<vmem>>, %arg3: memref<16x128xf32, #tpu.memory_space<vmem>>, %arg4: memref<8x128xf32, #tpu.memory_space<vmem>>, %arg5: memref<8x128xf32, #tpu.memory_space<vmem>>) attributes {dimension_semantics = [#tpu.dimension_semantics<parallel>, #tpu.dimension_semantics<arbitrary>], iteration_bounds = array<i64: 1, 1>, scalar_prefetch = 0 : i64, scratch_operands = 1 : i64, tpu.core_type = #tpu.core_type<tc>, window_params = [{transform_indices = @transform_0, window_bounds = array<i64: 16, 128>}, {transform_indices = @transform_1, window_bounds = array<i64: 16, 128>}, {transform_indices = @transform_2, window_bounds = array<i64: 8, 128>}]} {
    %c0_i32 = arith.constant 0 : i32
    %0 = arith.cmpi eq, %arg1, %c0_i32 : i32
    %1 = arith.extui %0 : i1 to i32
    %c0_i32_0 = arith.constant 0 : i32
    %2 = arith.cmpi ne, %1, %c0_i32_0 : i32
    scf.if %2 {
      %cst_16 = arith.constant 0.000000e+00 : f32
      %44 = vector.broadcast %cst_16 : f32 to vector<8x128xf32>
      %c0_17 = arith.constant 0 : index
      %c0_18 = arith.constant 0 : index
      %45 = vector.load %arg5[%c0_17, %c0_18] : memref<8x128xf32, #tpu.memory_space<vmem>>, vector<8x128xf32>
      tpu.vector_store %arg5[%c0_17, %c0_18], %44 {strides = array<i32>} : memref<8x128xf32, #tpu.memory_space<vmem>>, vector<8x128xf32>,
    } else {
    }
    %c0_i32_1 = arith.constant 0 : i32
    %c16_i32 = arith.constant 16 : i32
    %3 = arith.muli %c0_i32_1, %c16_i32 : i32
    %4 = tpu.assume_multiple %3, 16 : i32
    %5 = arith.index_cast %4 : i32 to index
    %c0 = arith.constant 0 : index
    %6 = vector.load %arg2[%5, %c0] : memref<16x128xf32, #tpu.memory_space<vmem>>, vector<16x128xf32>
    %7 = arith.index_cast %4 : i32 to index
    %c0_2 = arith.constant 0 : index
    %8 = vector.load %arg3[%7, %c0_2] : memref<16x128xf32, #tpu.memory_space<vmem>>, vector<16x128xf32>
    %9 = math.absf %6 : vector<16x128xf32>
    %cst = arith.constant 0.000000e+00 : f32
    %10 = vector.broadcast %cst : f32 to vector<16x128xf32>
    %11 = arith.subf %10, %9 : vector<16x128xf32>
    %12 = math.exp %11 : vector<16x128xf32>
    %cst_3 = arith.constant 0.000000e+00 : f32
    %13 = vector.broadcast %cst_3 : f32 to vector<16x128xf32>
    %14 = arith.maximumf %6, %13 : vector<16x128xf32>
    %15 = arith.mulf %6, %8 : vector<16x128xf32>
    %16 = arith.subf %14, %15 : vector<16x128xf32>
    %17 = math.log1p %12 : vector<16x128xf32>
    %18 = arith.addf %16, %17 : vector<16x128xf32>
    %cst_4 = arith.constant 5.000000e-01 : f32
    %19 = vector.broadcast %cst_4 : f32 to vector<16x128xf32>
    %20 = arith.mulf %19, %6 : vector<16x128xf32>
    %21 = math.tanh %20 : vector<16x128xf32>
    %cst_5 = arith.constant 5.000000e-01 : f32
    %22 = vector.broadcast %cst_5 : f32 to vector<16x128xf32>
    %23 = arith.mulf %22, %21 : vector<16x128xf32>
    %cst_6 = arith.constant 5.000000e-01 : f32
    %24 = vector.broadcast %cst_6 : f32 to vector<16x128xf32>
    %25 = arith.addf %23, %24 : vector<16x128xf32>
    %cst_7 = arith.constant -5.000000e-01 : f32
    %26 = vector.broadcast %cst_7 : f32 to vector<16x128xf32>
    %27 = arith.mulf %26, %8 : vector<16x128xf32>
    %cst_8 = arith.constant 7.500000e-01 : f32
    %28 = vector.broadcast %cst_8 : f32 to vector<16x128xf32>
    %29 = arith.addf %28, %27 : vector<16x128xf32>
    %30 = arith.subf %8, %25 : vector<16x128xf32>
    %31 = math.absf %30 : vector<16x128xf32>
    %32 = arith.mulf %18, %29 : vector<16x128xf32>
    %33 = math.sqrt %31 : vector<16x128xf32>
    %34 = arith.mulf %31, %33 : vector<16x128xf32>
    %35 = arith.mulf %32, %34 : vector<16x128xf32>
    %c0_9 = arith.constant 0 : index
    %c0_10 = arith.constant 0 : index
    %36 = vector.load %arg5[%c0_9, %c0_10] : memref<8x128xf32, #tpu.memory_space<vmem>>, vector<8x128xf32>
    %37 = vector.shape_cast %35 : vector<16x128xf32> to vector<2x8x128xf32>
    %cst_11 = arith.constant dense<0.000000e+00> : vector<8x128xf32>
    %38 = vector.multi_reduction <add>, %37, %cst_11 [0] : vector<2x8x128xf32> to vector<8x128xf32>
    %39 = arith.addf %36, %38 : vector<8x128xf32>
    %c0_12 = arith.constant 0 : index
    %c0_13 = arith.constant 0 : index
    %40 = vector.load %arg5[%c0_12, %c0_13] : memref<8x128xf32, #tpu.memory_space<vmem>>, vector<8x128xf32>
    tpu.vector_store %arg5[%c0_12, %c0_13], %39 {strides = array<i32>} : memref<8x128xf32, #tpu.memory_space<vmem>>, vector<8x128xf32>,
    %c1_i32 = arith.constant 1 : i32
    %c0_i32_14 = arith.constant 0 : i32
    %41 = arith.cmpi eq, %arg1, %c0_i32_14 : i32
    %42 = arith.extui %41 : i1 to i32
    %c0_i32_15 = arith.constant 0 : i32
    %43 = arith.cmpi ne, %42, %c0_i32_15 : i32
    scf.if %43 {
      %c0_16 = arith.constant 0 : index
      %c0_17 = arith.constant 0 : index
      %44 = vector.load %arg5[%c0_16, %c0_17] : memref<8x128xf32, #tpu.memory_space<vmem>>, vector<8x128xf32>
      %c0_18 = arith.constant 0 : index
      %c0_19 = arith.constant 0 : index
      %45 = vector.load %arg4[%c0_18, %c0_19] : memref<8x128xf32, #tpu.memory_space<vmem>>, vector<8x128xf32>
      tpu.vector_store %arg4[%c0_18, %c0_19], %44 {strides = array<i32>} : memref<8x128xf32, #tpu.memory_space<vmem>>, vector<8x128xf32>,
    } else {
    }
    return
  }
  func.func @transform_0(%arg0: i32, %arg1: i32) -> (i32, i32) {
    %c1_i32 = arith.constant 1 : i32
    %0 = arith.muli %arg0, %c1_i32 : i32
    %1 = arith.addi %0, %arg1 : i32
    %c0_i32 = arith.constant 0 : i32
    %c0_i32_0 = arith.constant 0 : i32
    return %1, %c0_i32 : i32, i32
  }
  func.func @transform_1(%arg0: i32, %arg1: i32) -> (i32, i32) {
    %c1_i32 = arith.constant 1 : i32
    %0 = arith.muli %arg0, %c1_i32 : i32
    %1 = arith.addi %0, %arg1 : i32
    %c0_i32 = arith.constant 0 : i32
    %c0_i32_0 = arith.constant 0 : i32
    return %1, %c0_i32 : i32, i32
  }
  func.func @transform_2(%arg0: i32, %arg1: i32) -> (i32, i32) {
    %c0_i32 = arith.constant 0 : i32
    %c0_i32_0 = arith.constant 0 : i32
    return %arg0, %c0_i32 : i32, i32
  }
}

</mosaic_0001>

<bundles_post_ra>
// kernel: tpu_custom_call.1
= control target key start
LH: loop header
LB: loop body
LE: loop exit
PB: predicated region body
PF: predicated region fallthrough
CT: control target
= control target key end

     0   :  { %7 = vsyncpa [#allocation4], 0  ;;  %s311_s0 = inlined_call_operand.hbm [shape: f32[16,128], index: 0, kind: input, shape index: {}]   ;;  %s312_s1 = inlined_call_operand.hbm [shape: f32[16,128], index: 1, kind: input, shape index: {}]   ;;  %s313_s2 = inlined_call_operand.hbm [shape: f32[8,128], index: 2, kind: output, shape index: {}]  }
   0x1   :  { %8 = vsyncpa [#allocation7], 0 }
   0x2   :  { %9 = vsyncpa [#allocation5], 0  ;;  %s249_s9 = smov [#allocation3]   ;;  %s177_s13 = scalar_lea.hbm %s311_s0, 256 }
   0x3   :  { %s19_s10 = sshll.u32 %s249_s9, 4  ;;  %p178_p0 = scmp.ne.s32.totalorder %s311_s0, %s177_s13  ;;  %s20_s10 = int_to_ptr.vmem [resolvable:$true] %s19_s10 }
   0x4   :  { %p181_p1 = scmp.lt.u32.totalorder %s177_s13, %s311_s0 }
   0x6   :  { %p183_p2 = pnand %p181_p1, %p178_p0 }
   0x8   :  { %186 = shalt.err (!%p183_p2)
}
   0x9   :  { %s187_s18 = scalar_lea.vmem %s20_s10, 256  ;;  %p192_p4 = scmp.lt.s32.totalorder %s20_s10, %s20_s10 }
   0xa   :  { %p188_p3 = scmp.ne.s32.totalorder %s20_s10, %s187_s18  ;;  %p193_p5 = scmp.lt.s32.totalorder %s187_s18, %s187_s18 }
   0xc   :  { %p194_p6 = por %p193_p5, %p192_p4 }
   0xe   :  { %p195_p7 = pnand %p194_p6, %p188_p3 }
  0x10   :  { %198 = shalt.err (!%p195_p7)
}
  0x11   :  { %s250_s19 = smov 128   ;;  %s251_s20 = smov 8  }
  0x12   :  { %25 = dma.hbm_to_vmem [thread:$0]  %s311_s0, 256, %s20_s10, [#allocation4], %s250_s19, %s250_s19, %s251_s20  }
  0x13   :  { %s252_s23 = smov [#allocation6]   ;;  %s199_s27 = scalar_lea.hbm %s312_s1, 256 }
  0x14   :  { %s35_s24 = sshll.u32 %s252_s23, 4  ;;  %p200_p8 = scmp.ne.s32.totalorder %s312_s1, %s199_s27  ;;  %s36_s24 = int_to_ptr.vmem [resolvable:$true] %s35_s24 }
  0x15   :  { %p203_p9 = scmp.lt.u32.totalorder %s199_s27, %s312_s1 }
  0x17   :  { %p205_p10 = pnand %p203_p9, %p200_p8 }
  0x19   :  { %208 = shalt.err (!%p205_p10)
}
  0x1a   :  { %s209_s4 = scalar_lea.vmem %s36_s24, 256  ;;  %p214_p12 = scmp.lt.s32.totalorder %s36_s24, %s36_s24 }
  0x1b   :  { %p210_p11 = scmp.ne.s32.totalorder %s36_s24, %s209_s4  ;;  %p215_p13 = scmp.lt.s32.totalorder %s209_s4, %s209_s4 }
  0x1d   :  { %p216_p0 = por %p215_p13, %p214_p12 }
  0x1f   :  { %p217_p1 = pnand %p216_p0, %p210_p11 }
  0x21   :  { %220 = shalt.err (!%p217_p1)
}
  0x22   :  { %41 = dma.hbm_to_vmem [thread:$0]  %s312_s1, 256, %s36_s24, [#allocation7], %s250_s19, %s250_s19, %s251_s20  }
  0x23   :  { %243 = dma.done.wait [#allocation4], 256  }
  0x24   :  { %244 = vsyncadd [#allocation4], 4294967040 }
  0x25   :  { %245 = dma.done.wait [#allocation7], 256  }
  0x26   :  { %246 = vsyncadd [#allocation7], 4294967040  ;;  %v57_v0 = vld [vmem:[#allocation3] sm:$0xff]  ;;  %v58_v1 = vld [vmem:[#allocation3 + $0x8] sm:$0xff]  ;;  %s253_s1 = smov [#allocation8]  }
  0x27   :  { %v61_v2 = vand.u32 2147483647, %v57_v0  ;;  %v62_v3 = vand.u32 2147483647, %v58_v1  ;;  %v95_v4 = vmul.f32 0.5, %v57_v0  ;;  %v96_v5 = vmul.f32 0.5, %v58_v1 }
  0x28   :  { %v59_v13 = vld [vmem:[#allocation6] sm:$0xff]  ;;  %v60_v16 = vld [vmem:[#allocation6 + $0x8] sm:$0xff]  ;;  %v69_v29 = vmax.f32 %v57_v0, 0.0  ;;  %v70_v33 = vmax.f32 %v58_v1, 0.0  ;;  %s146_s6 = sshll.u32 %s253_s1, 4  ;;  %s147_s6 = int_to_ptr.vmem [resolvable:$true] %s146_s6 }
  0x29   :  { %v63_v6 = vsub.f32 0.0, %v61_v2  ;;  %v64_v7 = vsub.f32 0.0, %v62_v3  ;;  %161 = vtanh.f32 %v95_v4  ;;  %v71_v30 = vmul.f32 %v59_v13, %v57_v0  ;;  %s221_s7 = scalar_lea.vmem %s147_s6, 128  ;;  %p226_p3 = scmp.lt.s32.totalorder %s147_s6, %s147_s6 }
  0x2a   :  { %163 = vtanh.f32 %v96_v5  ;;  %v72_v34 = vmul.f32 %v60_v16, %v58_v1  ;;  %v103_v36 = vmul.f32 -0.5, %v59_v13  ;;  %v104_v37 = vmul.f32 -0.5, %v60_v16  ;;  %p222_p2 = scmp.ne.s32.totalorder %s147_s6, %s221_s7  ;;  %p227_p4 = scmp.lt.s32.totalorder %s221_s7, %s221_s7 }
  0x2b   :  { %v65_v8 = vmul.f32 1.442695, %v63_v6  ;;  %v67_v9 = vmul.f32 1.442695, %v64_v7  ;;  %v73_v40 = vsub.f32 %v69_v29, %v71_v30 }
  0x2c   :  { %v74_v44 = vsub.f32 %v70_v33, %v72_v34  ;;  %v105_v47 = vadd.f32 0.75, %v103_v36  ;;  %v106_v48 = vadd.f32 0.75, %v104_v37  ;;  %p228_p5 = por %p227_p4, %p226_p3 }
  0x2d   :  { %165 = vpow2.f32 %v65_v8 }
  0x2e   :  { %167 = vpow2.f32 %v67_v9  ;;  %p229_p6 = pnand %p228_p5, %p222_p2 }
  0x33   :  { %v162_v10 = vpop.eup %161 }
  0x34   :  { %v164_v11 = vpop.eup %163  ;;  %v99_v12 = vmul.f32 0.5, %v162_v10 }
  0x35   :  { %v100_v14 = vmul.f32 0.5, %v164_v11 }
  0x36   :  { %v101_v17 = vadd.f32 0.5, %v99_v12 }
  0x37   :  { %v166_v15 = vpop.eup %165  ;;  %v102_v20 = vadd.f32 0.5, %v100_v14 }
  0x38   :  { %v168_v18 = vpop.eup %167  ;;  %v75_v19 = vadd.f32 1.0, %v166_v15  ;;  %v107_v22 = vsub.f32 %v59_v13, %v101_v17  ;;  %v78_v24 = vmul.f32 -0.5, %v166_v15  ;;  %v81_v31 = vand.u32 2147483647, %v166_v15 }
  0x39   :  { %v84_v21 = vadd.f32 1.0, %v168_v18  ;;  %v108_v23 = vsub.f32 %v60_v16, %v102_v20  ;;  %v87_v26 = vmul.f32 -0.5, %v168_v18  ;;  %v90_v35 = vand.u32 2147483647, %v168_v18 }
  0x3a   :  { %169 = vlog2.f32 %v75_v19  ;;  %v109_v25 = vand.u32 2147483647, %v107_v22  ;;  %v79_v28 = vadd.f32 1.0, %v78_v24  ;;  %vm293_vm0 = vcmp.lt.f32.partialorder %v81_v31, 0.0004427343 }
  0x3b   :  { %171 = vlog2.f32 %v84_v21  ;;  %v110_v27 = vand.u32 2147483647, %v108_v23  ;;  %v88_v32 = vadd.f32 1.0, %v87_v26  ;;  %vm91_vm1 = vcmp.lt.f32.partialorder %v90_v35, 0.0004427343 }
  0x3c   :  { %173 = vrsqrt.f32 %v109_v25  ;;  %v80_v38 = vmul.f32 %v166_v15, %v79_v28  ;;  %vm115_vm2 = vcmp.eq.f32.partialorder %v109_v25, inf  ;;  %vm117_vm3 = vcmp.eq.f32.partialorder %v109_v25, 0.0 }
  0x3d   :  { %175 = vrsqrt.f32 %v110_v27  ;;  %v89_v42 = vmul.f32 %v168_v18, %v88_v32  ;;  %v118_v51 = vand.u32 2147483648, %v109_v25  ;;  %vm122_vm4 = vcmp.eq.f32.partialorder %v110_v27, inf }
  0x3e   :  { %v125_v56 = vand.u32 2147483648, %v110_v27  ;;  %vm124_vm5 = vcmp.eq.f32.partialorder %v110_v27, 0.0 }
  0x44   :  { %v170_v39 = vpop.eup %169 }
  0x45   :  { %v172_v43 = vpop.eup %171  ;;  %v77_v45 = vmul.f32 0.6931472, %v170_v39 }
  0x46   :  { %v86_v46 = vmul.f32 0.6931472, %v172_v43  ;;  %v174_v49 = vpop.eup %173 }
  0x47   :  { %v83_v50 = vsel %vm293_vm0, %v80_v38, %v77_v45  ;;  %v176_v52 = vpop.eup %175  ;;  %v114_v55 = vmul.f32 %v174_v49, %v109_v25 }
  0x48   :  { %v92_v53 = vsel %vm91_vm1, %v89_v42, %v86_v46  ;;  %v93_v54 = vadd.f32 %v83_v50, %v73_v40  ;;  %v121_v58 = vmul.f32 %v176_v52, %v110_v27 }
  0x49   :  { %v94_v57 = vadd.f32 %v92_v53, %v74_v44  ;;  %v116_v60 = vsel %vm115_vm2, %v109_v25, %v114_v55 }
  0x4a   :  { %v111_v59 = vmul.f32 %v105_v47, %v93_v54  ;;  %v119_v62 = vsel %vm117_vm3, %v118_v51, %v116_v60  ;;  %v123_v63 = vsel %vm122_vm4, %v110_v27, %v121_v58 }
  0x4b   :  { %v112_v61 = vmul.f32 %v106_v48, %v94_v57  ;;  %v126_v0 = vsel %vm124_vm5, %v125_v56, %v123_v63  ;;  %v127_v1 = vmul.f32 %v119_v62, %v109_v25 }
  0x4c   :  { %v128_v2 = vmul.f32 %v126_v0, %v110_v27 }
  0x4d   :  { %v129_v3 = vmul.f32 %v127_v1, %v111_v59 }
  0x4e   :  { %v130_v4 = vmul.f32 %v128_v2, %v112_v61 }
  0x50   :  { %v132_v5 = vadd.f32 %v130_v4, %v129_v3 }
  0x52   :  { %139 = vst [vmem:[#allocation8] sm:$0xff] %v132_v5 }
  0x53   :  { %232 = shalt.err (!%p229_p6)
}
  0x54   :  { %s233_s10 = scalar_lea.hbm %s313_s2, 128 }
  0x55   :  { %p234_p7 = scmp.ne.s32.totalorder %s313_s2, %s233_s10  ;;  %p237_p8 = scmp.lt.u32.totalorder %s233_s10, %s313_s2 }
  0x57   :  { %p239_p9 = pnand %p237_p8, %p234_p7 }
  0x59   :  { %242 = shalt.err (!%p239_p9)
}
  0x5a   :  { %149 = dma.vmem_to_hbm [thread:$0]  %s147_s6, 128, %s313_s2, [#allocation5]  }
  0x5b   :  { %247 = dma.done.wait [#allocation5], 128  }
  0x5c   :  { %248 = vsyncadd [#allocation5], 4294967168 }
  0x5d   :  { %153 = vsyncpa [#allocation4], 1 }
  0x5e   :  { %154 = vsyncpa [#allocation7], 1 }
  0x5f   :  { %155 = vsyncpa [#allocation5], 1 }

</bundles_post_ra>
